<compile_context>
chip_gen: v7x
topology: tpu7x:2x2x1
jax: 0.10.0
libtpu: 0.0.40
codegen_flags: <defaults>
</compile_context>

<pallas_src>
import functools

import jax
import jax.numpy as jnp
from jax.experimental import pallas as pl
from jax.experimental.pallas import tpu as pltpu

_LEAKY_SLOPE = 0.01  # TODO(synk): verify against the original ConvKernel.


def _apply_act(y, act, slope):
    if act == "relu":
        return jnp.maximum(y, 0.0)
    if act in ("leakyrelu", "leaky_relu", "lrelu"):
        return jnp.where(y >= 0.0, y, slope * y)
    return y  # linear / unknown -> identity


def _round_up(x, m):
    return ((x + m - 1) // m) * m


def _block_plan(n_block, ang_res, upscale_factor, channels, receptive_field):
    """Static descriptors of the fused block chain.

    The first block's input channels are pre-summed into its weights (the
    PyTorch model `expand`s the input across `channels` identical copies,
    which is exactly equivalent to summing the weights over that axis), so
    its contraction depth is a*a instead of channels*a*a.
    """
    a2 = ang_res * ang_res
    plan = []
    for i in range(n_block):
        k0 = a2 if i == 0 else channels * a2
        plan.append(dict(name=f"group_{i}", rf=receptive_field, k0=k0,
                         k_pad=_round_up(k0, 8), n=channels * a2,
                         presum=(i == 0)))
    k0 = a2 if n_block == 0 else channels * a2
    plan.append(dict(name="bottleneck", rf=1, k0=k0, k_pad=_round_up(k0, 8),
                     n=(upscale_factor ** 2) * a2, presum=(n_block == 0)))
    return plan


def _geometry(H, W, rf):
    p_lo = (rf - 1) // 2
    p_hi = (rf - 1) - p_lo
    Hp = H + rf - 1
    Wp = W + rf - 1
    extra = 1 if rf > 1 else 0          # extra zero row absorbs flat-shift overrun
    Lp = (Hp + extra) * Wp              # flat padded length of the resident act
    L_out = H * Wp                      # per-block matmul output lanes
    off_w = p_lo * (Wp + 1)             # flat offset of the padded interior
    return dict(p_lo=p_lo, p_hi=p_hi, Hp=Hp, Wp=Wp, extra=extra,
                Lp=Lp, L_out=L_out, off_w=off_w)


def _vmem_budget_bytes():
    cap = 64 * 1024 * 1024              # conservative default: v7x per-core VMEM
    try:
        cap = int(pltpu.get_tpu_info().vmem_capacity_bytes)
    except Exception:                   # info query is best-effort
        pass
    return int(cap * 0.85)


# ----------------------------------------------------------------------------
# Fused kernel: whole DimBlock chain for one batch element, VMEM-resident.
# ----------------------------------------------------------------------------
def _dimnet_chain_kernel(*refs, plan, Wp, L_out, Lp, off_w, k_in_pad, act,
                         slope):
    n_blk = len(plan)
    x_ref = refs[0]                      # (k_in_pad, Lp)  bf16, pre-padded input
    mask_ref = refs[1]                   # (1, L_out)      f32, 1 on valid cols
    wb_refs = refs[2:2 + 2 * n_blk]      # per block: (N, rf^2*K_pad) bf16, (N,1) f32
    o_ref = refs[2 + 2 * n_blk]          # (N_bn, L_out)   bf16
    act_scr = refs[2 + 2 * n_blk + 1]    # (K_max, Lp)     bf16, padded activations
    col_scr = refs[2 + 2 * n_blk + 2]    # (CR_max, L_out) bf16, im2col

    # Load this batch element's input into the resident activation buffer.
    # Everything outside it is zero (= the conv zero padding) and is kept zero
    # by the masked interior write-backs below.
    act_scr[...] = jnp.zeros_like(act_scr)
    act_scr[0:k_in_pad, :] = x_ref[...]

    mask = mask_ref[...]                 # zeroes the wrap-around columns

    for bi, blk in enumerate(plan):
        rf_b, k0, kp, n_out = blk["rf"], blk["k0"], blk["k_pad"], blk["n"]
        w_ref = wb_refs[2 * bi]
        b_ref = wb_refs[2 * bi + 1]

        # K rows beyond the previous block's outputs must be zero (the
        # matching weight columns are zero-padded too).
        if bi > 0 and kp > k0:
            act_scr[k0:kp, :] = jnp.zeros((kp - k0, Lp), act_scr.dtype)

        if rf_b > 1:
            # im2col: fold the rf*rf taps into the contraction dimension so a
            # single deep matmul replaces rf^2 shallow ones.
            t = 0
            for dh in range(rf_b):
                for dw in range(rf_b):
                    off = dh * Wp + dw
                    col_scr[t * kp:(t + 1) * kp, :] = (
                        act_scr[0:kp, off:off + L_out])
                    t += 1
            xin = col_scr[0:rf_b * rf_b * kp, :]
        else:
            # 1x1 conv: read the padded interior directly.
            xin = act_scr[0:kp, off_w:off_w + L_out]

        y = jnp.dot(w_ref[...], xin, preferred_element_type=jnp.float32)
        y = y + b_ref[...]                       # f32 epilogue
        y = _apply_act(y, act, slope)

        if bi < n_blk - 1:
            # Write back in padded layout; the mask re-zeroes the border
            # columns so the next block's taps see correct zero padding.
            y = y * mask
            act_scr[0:n_out, off_w:off_w + L_out] = y.astype(act_scr.dtype)
        else:
            o_ref[...] = y.astype(o_ref.dtype)


# ----------------------------------------------------------------------------
# Full DimNet_Plus forward (single fused pallas_call)
# ----------------------------------------------------------------------------
def dimnet_plus_forward(pic_in, prepared_params, *, n_block, ang_res,
                        receptive_field, upscale_factor, channels, activation,
                        leaky_slope=_LEAKY_SLOPE):
    """pic_in: (B, a, a, H, W) f32 -> (B, a, a, H*u, W*u) f32."""
    B, a, a2_, H, W = pic_in.shape
    assert a == ang_res and a2_ == ang_res
    a2 = a * a

    plan = _block_plan(n_block, ang_res, upscale_factor, channels,
                       receptive_field)
    g = _geometry(H, W, receptive_field)
    Wp, Lp, L_out, off_w = g["Wp"], g["Lp"], g["L_out"], g["off_w"]
    p_lo, p_hi, extra = g["p_lo"], g["p_hi"], g["extra"]

    k_in, k_in_pad = plan[0]["k0"], plan[0]["k_pad"]
    n_bn = plan[-1]["n"]
    k_max = _round_up(max(max(p_["k_pad"] for p_ in plan),
                          max(p_["n"] for p_ in plan)), 8)
    cr_rows = [p_["rf"] ** 2 * p_["k_pad"] for p_ in plan if p_["rf"] > 1]
    cr_max = _round_up(max(cr_rows) if cr_rows else 8, 8)

    # Host prep: NO channel broadcast; only the raw (a*a)-channel input is
    # spatially padded (plus one overrun row), channel-padded to a sublane
    # multiple, and flattened to the resident layout.
    x = pic_in.reshape(B, a2, H, W).astype(jnp.bfloat16)
    x = jnp.pad(x, ((0, 0), (0, k_in_pad - k_in),
                    (p_lo, p_hi + extra), (p_lo, p_hi)))
    x = x.reshape(B, k_in_pad, Lp)

    # Valid-column mask: 1 on real output columns, 0 on the rf-1 wrap columns
    # per row (which land exactly on the padded borders of the next block).
    col_idx = jax.lax.broadcasted_iota(jnp.int32, (1, L_out), 1) % Wp
    mask = (col_idx < W).astype(jnp.float32)

    # --- VMEM budget check (conservative: x2 buffers for every HBM block) ---
    est = 2 * k_in_pad * Lp * 2 + 2 * L_out * 4
    for p_ in plan:
        est += 2 * p_["n"] * (p_["rf"] ** 2) * p_["k_pad"] * 2   # weights
        est += 2 * p_["n"] * 4                                   # bias
    est += 2 * n_bn * L_out * 2                                  # output
    est += k_max * Lp * 2 + cr_max * L_out * 2                   # scratch
    budget = _vmem_budget_bytes()
    if est > budget:
        # TODO(synk): re-introduce K/N chunking or spatial banding for configs
        # whose fused working set does not fit a single core's VMEM.
        raise ValueError(f"fused DimNet chain needs ~{est} B of VMEM; "
                         f"per-core budget is {budget} B")
    vmem_limit = int(min(budget, max(4 * est, 32 * 1024 * 1024)))

    inputs = [x, mask]
    in_specs = [
        pl.BlockSpec((None, k_in_pad, Lp), lambda b: (b, 0, 0)),
        pl.BlockSpec((1, L_out), lambda b: (0, 0)),
    ]
    for p_ in plan:
        wk = prepared_params[p_["name"] + "_w"]
        bb = prepared_params[p_["name"] + "_b"]
        assert wk.shape == (p_["n"], p_["rf"] ** 2 * p_["k_pad"]), wk.shape
        inputs += [wk, bb]
        # Constant index maps: weights/bias are DMA'd once and stay resident.
        in_specs += [pl.BlockSpec(wk.shape, lambda b: (0, 0)),
                     pl.BlockSpec(bb.shape, lambda b: (0, 0))]

    kernel = functools.partial(
        _dimnet_chain_kernel, plan=plan, Wp=Wp, L_out=L_out, Lp=Lp,
        off_w=off_w, k_in_pad=k_in_pad, act=activation, slope=leaky_slope)

    out = pl.pallas_call(
        kernel,
        out_shape=jax.ShapeDtypeStruct((B, n_bn, L_out), jnp.bfloat16),
        grid=(B,),
        in_specs=in_specs,
        out_specs=pl.BlockSpec((None, n_bn, L_out), lambda b: (b, 0, 0)),
        scratch_shapes=[pltpu.VMEM((k_max, Lp), jnp.bfloat16),
                        pltpu.VMEM((cr_max, L_out), jnp.bfloat16)],
        compiler_params=pltpu.CompilerParams(
            dimension_semantics=("parallel",),
            vmem_limit_bytes=vmem_limit),
    )(*inputs)

    # Strip the rf-1 wrap columns, then 'spa' PixelShuffle + squeeze(1).
    out = out.reshape(B, n_bn, H, Wp)[:, :, :, :W]
    u = upscale_factor
    y = out.reshape(B, u, u, a, a, H, W)
    y = jnp.transpose(y, (0, 3, 4, 5, 1, 6, 2))
    return y.reshape(B, a, a, H * u, W * u).astype(jnp.float32)


# ----------------------------------------------------------------------------
# Parameter init (PyTorch layout) and prep (kernel layout)
# ----------------------------------------------------------------------------
def init_params(key, *, n_block, ang_res, receptive_field, upscale_factor,
                channels):
    params = {}
    a, rf = ang_res, receptive_field
    for i in range(n_block):
        key, k1, k2 = jax.random.split(key, 3)
        n_out = channels * a * a
        params[f"group_{i}_w"] = 0.1 * jax.random.normal(
            k1, (n_out, channels, a, a, rf, rf), jnp.float32)
        params[f"group_{i}_b"] = 0.01 * jax.random.normal(k2, (n_out,),
                                                          jnp.float32)
    key, k1, k2 = jax.random.split(key, 3)
    n_out = (upscale_factor ** 2) * a * a
    params["bottleneck_w"] = 0.1 * jax.random.normal(
        k1, (n_out, channels, a, a, 1, 1), jnp.float32)
    params["bottleneck_b"] = 0.01 * jax.random.normal(k2, (n_out,), jnp.float32)
    return params


def prepare_params(raw, *, n_block, ang_res, receptive_field, upscale_factor,
                   channels):
    """Pack each block's conv weights as ONE MXU-ready matrix.

    Packed layout: (N, rf*rf*K_pad) bf16 with column index t*K_pad + k,
    t = dh*rf + dw -- the spatial taps are folded into the contraction
    dimension so each block is a single deep matmul in the kernel.  The first
    block's weights are summed over the duplicated input-channel axis
    (exactly equivalent to the model's `expand`).
    """
    plan = _block_plan(n_block, ang_res, upscale_factor, channels,
                       receptive_field)
    prepared = {}
    for blk in plan:
        w = raw[blk["name"] + "_w"].astype(jnp.float32)
        b = raw[blk["name"] + "_b"].astype(jnp.float32)
        n_out = w.shape[0]
        rf = blk["rf"]
        if blk["presum"]:
            w = jnp.sum(w, axis=1)                         # (N, a, a, rf, rf)
        w = w.reshape(n_out, blk["k0"], rf, rf)
        if blk["k_pad"] > blk["k0"]:
            w = jnp.pad(w, ((0, 0), (0, blk["k_pad"] - blk["k0"]),
                            (0, 0), (0, 0)))
        w = jnp.transpose(w, (0, 2, 3, 1))                 # (N, rf, rf, K_pad)
        w = w.reshape(n_out, rf * rf * blk["k_pad"])
        prepared[blk["name"] + "_w"] = w.astype(jnp.bfloat16)
        prepared[blk["name"] + "_b"] = b.reshape(n_out, 1)
    return prepared


# ----------------------------------------------------------------------------
# Pure-JAX reference (matches the kernel's bf16 operand rounding points)
# ----------------------------------------------------------------------------
def _ref_dim_block(x, w, b, *, rf, act, slope):
    # x: (B, K0, H, W) f32, w: (N, K0, rf, rf) f32, b: (N,) f32
    B, K0, H, W = x.shape
    N = w.shape[0]
    wk = w.astype(jnp.bfloat16).astype(jnp.float32)
    p_lo = (rf - 1) // 2
    p_hi = (rf - 1) - p_lo
    xp = jnp.pad(x, ((0, 0), (0, 0), (p_lo, p_hi), (p_lo, p_hi)))
    acc = jnp.zeros((B, N, H, W), jnp.float32)
    for dh in range(rf):
        for dw in range(rf):
            xt = xp[:, :, dh:dh + H, dw:dw + W]
            acc = acc + jnp.einsum("nk,bkhw->bnhw", wk[:, :, dh, dw], xt,
                                   precision=jax.lax.Precision.HIGHEST)
    acc = acc + b.reshape(1, N, 1, 1)
    acc = _apply_act(acc, act, slope)
    return acc.astype(jnp.bfloat16).astype(jnp.float32)


def dimnet_plus_reference(pic_in, raw_params, *, n_block, ang_res,
                          receptive_field, upscale_factor, channels,
                          activation, leaky_slope=_LEAKY_SLOPE):
    B, a, a2_, H, W = pic_in.shape
    a2 = a * a
    plan = _block_plan(n_block, ang_res, upscale_factor, channels,
                       receptive_field)

    buf = pic_in.reshape(B, a2, H, W).astype(jnp.bfloat16).astype(jnp.float32)
    for blk in plan:
        w = raw_params[blk["name"] + "_w"].astype(jnp.float32)
        b = raw_params[blk["name"] + "_b"].astype(jnp.float32)
        if blk["presum"]:
            # `expand` across identical channel copies == summing the weights
            # over that axis (exact in f32).
            w = jnp.sum(w, axis=1)
        w = w.reshape(w.shape[0], blk["k0"], blk["rf"], blk["rf"])
        buf = _ref_dim_block(buf, w, b, rf=blk["rf"], act=activation,
                             slope=leaky_slope)

    u = upscale_factor
    y = buf.reshape(B, u, u, a, a, H, W)
    y = jnp.transpose(y, (0, 3, 4, 5, 1, 6, 2))
    return y.reshape(B, a, a, H * u, W * u).astype(jnp.float32)


# ----------------------------------------------------------------------------
if __name__ == "__main__":
    cfg = dict(n_block=2, ang_res=2, receptive_field=3,
               upscale_factor=2, channels=4, activation="relu")

    key = jax.random.PRNGKey(0)
    key, k_in = jax.random.split(key)
    B, a, H, W = 2, cfg["ang_res"], 16, 16
    pic_in = jax.random.normal(k_in, (B, a, a, H, W), jnp.float32)

    raw_params = init_params(key, n_block=cfg["n_block"], ang_res=cfg["ang_res"],
                             receptive_field=cfg["receptive_field"],
                             upscale_factor=cfg["upscale_factor"],
                             channels=cfg["channels"])
    prepared = prepare_params(raw_params, n_block=cfg["n_block"],
                              ang_res=cfg["ang_res"],
                              receptive_field=cfg["receptive_field"],
                              upscale_factor=cfg["upscale_factor"],
                              channels=cfg["channels"])

    fwd = jax.jit(functools.partial(dimnet_plus_forward, **cfg))
    out = jax.block_until_ready(fwd(pic_in, prepared))

    expected = (B, a, a, H * cfg["upscale_factor"], W * cfg["upscale_factor"])
    assert out.shape == expected, (out.shape, expected)
    assert out.dtype == jnp.float32
    assert bool(jnp.all(jnp.isfinite(out)))

    ref = dimnet_plus_reference(pic_in, raw_params, **cfg)
    max_err = float(jnp.max(jnp.abs(out - ref)))
    assert bool(jnp.allclose(out, ref, atol=2e-2, rtol=2e-2)), max_err

    print("KERNEL_OK")
</pallas_src>

<mosaic_0001>
module attributes {stable_mosaic.version = 11 : i64} {
  func.func @_dimnet_chain_kernel(%arg0: i32, %arg1: memref<1x8x342xbf16, #tpu.memory_space<vmem>>, %arg2: memref<1x288xf32, #tpu.memory_space<vmem>>, %arg3: memref<16x72xbf16, #tpu.memory_space<vmem>>, %arg4: memref<16x1xf32, #tpu.memory_space<vmem>>, %arg5: memref<16x144xbf16, #tpu.memory_space<vmem>>, %arg6: memref<16x1xf32, #tpu.memory_space<vmem>>, %arg7: memref<16x16xbf16, #tpu.memory_space<vmem>>, %arg8: memref<16x1xf32, #tpu.memory_space<vmem>>, %arg9: memref<1x16x288xbf16, #tpu.memory_space<vmem>>, %arg10: memref<16x342xbf16, #tpu.memory_space<vmem>>, %arg11: memref<144x288xbf16, #tpu.memory_space<vmem>>) attributes {dimension_semantics = [#tpu.dimension_semantics<parallel>], iteration_bounds = array<i64: 2>, scalar_prefetch = 0 : i64, scratch_operands = 2 : i64, tpu.core_type = #tpu.core_type<tc>, window_params = [{transform_indices = @transform_0, window_bounds = array<i64: 1, 8, 342>}, {pipeline_mode = #tpu.pipeline_mode<synchronous>, transform_indices = @transform_1, window_bounds = array<i64: 1, 288>}, {pipeline_mode = #tpu.pipeline_mode<synchronous>, transform_indices = @transform_2, window_bounds = array<i64: 16, 72>}, {pipeline_mode = #tpu.pipeline_mode<synchronous>, transform_indices = @transform_3, window_bounds = array<i64: 16, 1>}, {pipeline_mode = #tpu.pipeline_mode<synchronous>, transform_indices = @transform_4, window_bounds = array<i64: 16, 144>}, {pipeline_mode = #tpu.pipeline_mode<synchronous>, transform_indices = @transform_5, window_bounds = array<i64: 16, 1>}, {pipeline_mode = #tpu.pipeline_mode<synchronous>, transform_indices = @transform_6, window_bounds = array<i64: 16, 16>}, {pipeline_mode = #tpu.pipeline_mode<synchronous>, transform_indices = @transform_7, window_bounds = array<i64: 16, 1>}, {transform_indices = @transform_8, window_bounds = array<i64: 1, 16, 288>}]} {
    %cst = arith.constant 0.000000e+00 : bf16
    %0 = vector.broadcast %cst : bf16 to vector<16x342xbf16>
    %c0 = arith.constant 0 : index
    %c0_0 = arith.constant 0 : index
    %1 = vector.load %arg10[%c0, %c0_0] : memref<16x342xbf16, #tpu.memory_space<vmem>>, vector<16x342xbf16>
    tpu.vector_store %arg10[%c0, %c0_0], %0 {strides = array<i32>} : memref<16x342xbf16, #tpu.memory_space<vmem>>, vector<16x342xbf16>,
    %c0_1 = arith.constant 0 : index
    %c0_2 = arith.constant 0 : index
    %c0_3 = arith.constant 0 : index
    %2 = vector.load %arg1[%c0_1, %c0_2, %c0_3] : memref<1x8x342xbf16, #tpu.memory_space<vmem>>, vector<1x8x342xbf16>
    %3 = vector.shape_cast %2 : vector<1x8x342xbf16> to vector<8x342xbf16>
    %c0_4 = arith.constant 0 : index
    %c0_5 = arith.constant 0 : index
    %4 = vector.load %arg10[%c0_4, %c0_5] : memref<16x342xbf16, #tpu.memory_space<vmem>>, vector<8x342xbf16>
    tpu.vector_store %arg10[%c0_4, %c0_5], %3 {strides = array<i32>} : memref<16x342xbf16, #tpu.memory_space<vmem>>, vector<8x342xbf16>,
    %c0_6 = arith.constant 0 : index
    %c0_7 = arith.constant 0 : index
    %5 = vector.load %arg2[%c0_6, %c0_7] : memref<1x288xf32, #tpu.memory_space<vmem>>, vector<1x288xf32>
    %c0_8 = arith.constant 0 : index
    %c0_9 = arith.constant 0 : index
    %6 = vector.load %arg10[%c0_8, %c0_9] : memref<16x342xbf16, #tpu.memory_space<vmem>>, vector<8x288xbf16>
    %c0_10 = arith.constant 0 : index
    %c0_11 = arith.constant 0 : index
    %7 = vector.load %arg11[%c0_10, %c0_11] : memref<144x288xbf16, #tpu.memory_space<vmem>>, vector<8x288xbf16>
    tpu.vector_store %arg11[%c0_10, %c0_11], %6 {strides = array<i32>} : memref<144x288xbf16, #tpu.memory_space<vmem>>, vector<8x288xbf16>,
    %c0_12 = arith.constant 0 : index
    %c1 = arith.constant 1 : index
    %8 = vector.load %arg10[%c0_12, %c1] : memref<16x342xbf16, #tpu.memory_space<vmem>>, vector<8x288xbf16>
    %c8 = arith.constant 8 : index
    %c0_13 = arith.constant 0 : index
    %9 = vector.load %arg11[%c8, %c0_13] : memref<144x288xbf16, #tpu.memory_space<vmem>>, vector<8x288xbf16>
    tpu.vector_store %arg11[%c8, %c0_13], %8 {strides = array<i32>} : memref<144x288xbf16, #tpu.memory_space<vmem>>, vector<8x288xbf16>,
    %c0_14 = arith.constant 0 : index
    %c2 = arith.constant 2 : index
    %10 = vector.load %arg10[%c0_14, %c2] : memref<16x342xbf16, #tpu.memory_space<vmem>>, vector<8x288xbf16>
    %c16 = arith.constant 16 : index
    %c0_15 = arith.constant 0 : index
    %11 = vector.load %arg11[%c16, %c0_15] : memref<144x288xbf16, #tpu.memory_space<vmem>>, vector<8x288xbf16>
    tpu.vector_store %arg11[%c16, %c0_15], %10 {strides = array<i32>} : memref<144x288xbf16, #tpu.memory_space<vmem>>, vector<8x288xbf16>,
    %c0_16 = arith.constant 0 : index
    %c18 = arith.constant 18 : index
    %12 = vector.load %arg10[%c0_16, %c18] : memref<16x342xbf16, #tpu.memory_space<vmem>>, vector<8x288xbf16>
    %c24 = arith.constant 24 : index
    %c0_17 = arith.constant 0 : index
    %13 = vector.load %arg11[%c24, %c0_17] : memref<144x288xbf16, #tpu.memory_space<vmem>>, vector<8x288xbf16>
    tpu.vector_store %arg11[%c24, %c0_17], %12 {strides = array<i32>} : memref<144x288xbf16, #tpu.memory_space<vmem>>, vector<8x288xbf16>,
    %c0_18 = arith.constant 0 : index
    %c19 = arith.constant 19 : index
    %14 = vector.load %arg10[%c0_18, %c19] : memref<16x342xbf16, #tpu.memory_space<vmem>>, vector<8x288xbf16>
    %c32 = arith.constant 32 : index
    %c0_19 = arith.constant 0 : index
    %15 = vector.load %arg11[%c32, %c0_19] : memref<144x288xbf16, #tpu.memory_space<vmem>>, vector<8x288xbf16>
    tpu.vector_store %arg11[%c32, %c0_19], %14 {strides = array<i32>} : memref<144x288xbf16, #tpu.memory_space<vmem>>, vector<8x288xbf16>,
    %c0_20 = arith.constant 0 : index
    %c20 = arith.constant 20 : index
    %16 = vector.load %arg10[%c0_20, %c20] : memref<16x342xbf16, #tpu.memory_space<vmem>>, vector<8x288xbf16>
    %c40 = arith.constant 40 : index
    %c0_21 = arith.constant 0 : index
    %17 = vector.load %arg11[%c40, %c0_21] : memref<144x288xbf16, #tpu.memory_space<vmem>>, vector<8x288xbf16>
    tpu.vector_store %arg11[%c40, %c0_21], %16 {strides = array<i32>} : memref<144x288xbf16, #tpu.memory_space<vmem>>, vector<8x288xbf16>,
    %c0_22 = arith.constant 0 : index
    %c36 = arith.constant 36 : index
    %18 = vector.load %arg10[%c0_22, %c36] : memref<16x342xbf16, #tpu.memory_space<vmem>>, vector<8x288xbf16>
    %c48 = arith.constant 48 : index
    %c0_23 = arith.constant 0 : index
    %19 = vector.load %arg11[%c48, %c0_23] : memref<144x288xbf16, #tpu.memory_space<vmem>>, vector<8x288xbf16>
    tpu.vector_store %arg11[%c48, %c0_23], %18 {strides = array<i32>} : memref<144x288xbf16, #tpu.memory_space<vmem>>, vector<8x288xbf16>,
    %c0_24 = arith.constant 0 : index
    %c37 = arith.constant 37 : index
    %20 = vector.load %arg10[%c0_24, %c37] : memref<16x342xbf16, #tpu.memory_space<vmem>>, vector<8x288xbf16>
    %c56 = arith.constant 56 : index
    %c0_25 = arith.constant 0 : index
    %21 = vector.load %arg11[%c56, %c0_25] : memref<144x288xbf16, #tpu.memory_space<vmem>>, vector<8x288xbf16>
    tpu.vector_store %arg11[%c56, %c0_25], %20 {strides = array<i32>} : memref<144x288xbf16, #tpu.memory_space<vmem>>, vector<8x288xbf16>,
    %c0_26 = arith.constant 0 : index
    %c38 = arith.constant 38 : index
    %22 = vector.load %arg10[%c0_26, %c38] : memref<16x342xbf16, #tpu.memory_space<vmem>>, vector<8x288xbf16>
    %c64 = arith.constant 64 : index
    %c0_27 = arith.constant 0 : index
    %23 = vector.load %arg11[%c64, %c0_27] : memref<144x288xbf16, #tpu.memory_space<vmem>>, vector<8x288xbf16>
    tpu.vector_store %arg11[%c64, %c0_27], %22 {strides = array<i32>} : memref<144x288xbf16, #tpu.memory_space<vmem>>, vector<8x288xbf16>,
    %c0_28 = arith.constant 0 : index
    %c0_29 = arith.constant 0 : index
    %24 = vector.load %arg11[%c0_28, %c0_29] : memref<144x288xbf16, #tpu.memory_space<vmem>>, vector<72x288xbf16>
    %c0_30 = arith.constant 0 : index
    %c0_31 = arith.constant 0 : index
    %25 = vector.load %arg3[%c0_30, %c0_31] : memref<16x72xbf16, #tpu.memory_space<vmem>>, vector<16x72xbf16>
    %cst_32 = arith.constant dense<0.000000e+00> : vector<16x288xf32>
    %26 = tpu.matmul %25, %24, %cst_32 {dimension_numbers = #tpu.dot_dimension_numbers<[1], [0], [0], [1], [0, 0, 1, 1], [], []>} : vector<16x72xbf16>, vector<72x288xbf16>, vector<16x288xf32> -> vector<16x288xf32>
    %c0_33 = arith.constant 0 : index
    %c0_34 = arith.constant 0 : index
    %27 = vector.load %arg4[%c0_33, %c0_34] : memref<16x1xf32, #tpu.memory_space<vmem>>, vector<16x1xf32>
    %28 = vector.broadcast %27 : vector<16x1xf32> to vector<16x288xf32>
    %29 = arith.addf %26, %28 : vector<16x288xf32>
    %cst_35 = arith.constant 0.000000e+00 : f32
    %30 = vector.broadcast %cst_35 : f32 to vector<16x288xf32>
    %31 = arith.maximumf %29, %30 : vector<16x288xf32>
    %32 = vector.broadcast %5 : vector<1x288xf32> to vector<16x288xf32>
    %33 = arith.mulf %31, %32 : vector<16x288xf32>
    %34 = arith.truncf %33 : vector<16x288xf32> to vector<16x288xbf16>
    %c0_36 = arith.constant 0 : index
    %c19_37 = arith.constant 19 : index
    %35 = vector.load %arg10[%c0_36, %c19_37] : memref<16x342xbf16, #tpu.memory_space<vmem>>, vector<16x288xbf16>
    tpu.vector_store %arg10[%c0_36, %c19_37], %34 {strides = array<i32>} : memref<16x342xbf16, #tpu.memory_space<vmem>>, vector<16x288xbf16>,
    %c0_38 = arith.constant 0 : index
    %c0_39 = arith.constant 0 : index
    %36 = vector.load %arg10[%c0_38, %c0_39] : memref<16x342xbf16, #tpu.memory_space<vmem>>, vector<16x288xbf16>
    %c0_40 = arith.constant 0 : index
    %c0_41 = arith.constant 0 : index
    %37 = vector.load %arg11[%c0_40, %c0_41] : memref<144x288xbf16, #tpu.memory_space<vmem>>, vector<16x288xbf16>
    tpu.vector_store %arg11[%c0_40, %c0_41], %36 {strides = array<i32>} : memref<144x288xbf16, #tpu.memory_space<vmem>>, vector<16x288xbf16>,
    %c0_42 = arith.constant 0 : index
    %c1_43 = arith.constant 1 : index
    %38 = vector.load %arg10[%c0_42, %c1_43] : memref<16x342xbf16, #tpu.memory_space<vmem>>, vector<16x288xbf16>
    %c16_44 = arith.constant 16 : index
    %c0_45 = arith.constant 0 : index
    %39 = vector.load %arg11[%c16_44, %c0_45] : memref<144x288xbf16, #tpu.memory_space<vmem>>, vector<16x288xbf16>
    tpu.vector_store %arg11[%c16_44, %c0_45], %38 {strides = array<i32>} : memref<144x288xbf16, #tpu.memory_space<vmem>>, vector<16x288xbf16>,
    %c0_46 = arith.constant 0 : index
    %c2_47 = arith.constant 2 : index
    %40 = vector.load %arg10[%c0_46, %c2_47] : memref<16x342xbf16, #tpu.memory_space<vmem>>, vector<16x288xbf16>
    %c32_48 = arith.constant 32 : index
    %c0_49 = arith.constant 0 : index
    %41 = vector.load %arg11[%c32_48, %c0_49] : memref<144x288xbf16, #tpu.memory_space<vmem>>, vector<16x288xbf16>
    tpu.vector_store %arg11[%c32_48, %c0_49], %40 {strides = array<i32>} : memref<144x288xbf16, #tpu.memory_space<vmem>>, vector<16x288xbf16>,
    %c0_50 = arith.constant 0 : index
    %c18_51 = arith.constant 18 : index
    %42 = vector.load %arg10[%c0_50, %c18_51] : memref<16x342xbf16, #tpu.memory_space<vmem>>, vector<16x288xbf16>
    %c48_52 = arith.constant 48 : index
    %c0_53 = arith.constant 0 : index
    %43 = vector.load %arg11[%c48_52, %c0_53] : memref<144x288xbf16, #tpu.memory_space<vmem>>, vector<16x288xbf16>
    tpu.vector_store %arg11[%c48_52, %c0_53], %42 {strides = array<i32>} : memref<144x288xbf16, #tpu.memory_space<vmem>>, vector<16x288xbf16>,
    %c0_54 = arith.constant 0 : index
    %c19_55 = arith.constant 19 : index
    %44 = vector.load %arg10[%c0_54, %c19_55] : memref<16x342xbf16, #tpu.memory_space<vmem>>, vector<16x288xbf16>
    %c64_56 = arith.constant 64 : index
    %c0_57 = arith.constant 0 : index
    %45 = vector.load %arg11[%c64_56, %c0_57] : memref<144x288xbf16, #tpu.memory_space<vmem>>, vector<16x288xbf16>
    tpu.vector_store %arg11[%c64_56, %c0_57], %44 {strides = array<i32>} : memref<144x288xbf16, #tpu.memory_space<vmem>>, vector<16x288xbf16>,
    %c0_58 = arith.constant 0 : index
    %c20_59 = arith.constant 20 : index
    %46 = vector.load %arg10[%c0_58, %c20_59] : memref<16x342xbf16, #tpu.memory_space<vmem>>, vector<16x288xbf16>
    %c80 = arith.constant 80 : index
    %c0_60 = arith.constant 0 : index
    %47 = vector.load %arg11[%c80, %c0_60] : memref<144x288xbf16, #tpu.memory_space<vmem>>, vector<16x288xbf16>
    tpu.vector_store %arg11[%c80, %c0_60], %46 {strides = array<i32>} : memref<144x288xbf16, #tpu.memory_space<vmem>>, vector<16x288xbf16>,
    %c0_61 = arith.constant 0 : index
    %c36_62 = arith.constant 36 : index
    %48 = vector.load %arg10[%c0_61, %c36_62] : memref<16x342xbf16, #tpu.memory_space<vmem>>, vector<16x288xbf16>
    %c96 = arith.constant 96 : index
    %c0_63 = arith.constant 0 : index
    %49 = vector.load %arg11[%c96, %c0_63] : memref<144x288xbf16, #tpu.memory_space<vmem>>, vector<16x288xbf16>
    tpu.vector_store %arg11[%c96, %c0_63], %48 {strides = array<i32>} : memref<144x288xbf16, #tpu.memory_space<vmem>>, vector<16x288xbf16>,
    %c0_64 = arith.constant 0 : index
    %c37_65 = arith.constant 37 : index
    %50 = vector.load %arg10[%c0_64, %c37_65] : memref<16x342xbf16, #tpu.memory_space<vmem>>, vector<16x288xbf16>
    %c112 = arith.constant 112 : index
    %c0_66 = arith.constant 0 : index
    %51 = vector.load %arg11[%c112, %c0_66] : memref<144x288xbf16, #tpu.memory_space<vmem>>, vector<16x288xbf16>
    tpu.vector_store %arg11[%c112, %c0_66], %50 {strides = array<i32>} : memref<144x288xbf16, #tpu.memory_space<vmem>>, vector<16x288xbf16>,
    %c0_67 = arith.constant 0 : index
    %c38_68 = arith.constant 38 : index
    %52 = vector.load %arg10[%c0_67, %c38_68] : memref<16x342xbf16, #tpu.memory_space<vmem>>, vector<16x288xbf16>
    %c128 = arith.constant 128 : index
    %c0_69 = arith.constant 0 : index
    %53 = vector.load %arg11[%c128, %c0_69] : memref<144x288xbf16, #tpu.memory_space<vmem>>, vector<16x288xbf16>
    tpu.vector_store %arg11[%c128, %c0_69], %52 {strides = array<i32>} : memref<144x288xbf16, #tpu.memory_space<vmem>>, vector<16x288xbf16>,
    %c0_70 = arith.constant 0 : index
    %c0_71 = arith.constant 0 : index
    %54 = vector.load %arg11[%c0_70, %c0_71] : memref<144x288xbf16, #tpu.memory_space<vmem>>, vector<144x288xbf16>
    %c0_72 = arith.constant 0 : index
    %c0_73 = arith.constant 0 : index
    %55 = vector.load %arg5[%c0_72, %c0_73] : memref<16x144xbf16, #tpu.memory_space<vmem>>, vector<16x144xbf16>
    %cst_74 = arith.constant dense<0.000000e+00> : vector<16x288xf32>
    %56 = tpu.matmul %55, %54, %cst_74 {dimension_numbers = #tpu.dot_dimension_numbers<[1], [0], [0], [1], [0, 0, 1, 1], [], []>} : vector<16x144xbf16>, vector<144x288xbf16>, vector<16x288xf32> -> vector<16x288xf32>
    %c0_75 = arith.constant 0 : index
    %c0_76 = arith.constant 0 : index
    %57 = vector.load %arg6[%c0_75, %c0_76] : memref<16x1xf32, #tpu.memory_space<vmem>>, vector<16x1xf32>
    %58 = vector.broadcast %57 : vector<16x1xf32> to vector<16x288xf32>
    %59 = arith.addf %56, %58 : vector<16x288xf32>
    %cst_77 = arith.constant 0.000000e+00 : f32
    %60 = vector.broadcast %cst_77 : f32 to vector<16x288xf32>
    %61 = arith.maximumf %59, %60 : vector<16x288xf32>
    %62 = vector.broadcast %5 : vector<1x288xf32> to vector<16x288xf32>
    %63 = arith.mulf %61, %62 : vector<16x288xf32>
    %64 = arith.truncf %63 : vector<16x288xf32> to vector<16x288xbf16>
    %c0_78 = arith.constant 0 : index
    %c19_79 = arith.constant 19 : index
    %65 = vector.load %arg10[%c0_78, %c19_79] : memref<16x342xbf16, #tpu.memory_space<vmem>>, vector<16x288xbf16>
    tpu.vector_store %arg10[%c0_78, %c19_79], %64 {strides = array<i32>} : memref<16x342xbf16, #tpu.memory_space<vmem>>, vector<16x288xbf16>,
    %c0_80 = arith.constant 0 : index
    %c19_81 = arith.constant 19 : index
    %66 = vector.load %arg10[%c0_80, %c19_81] : memref<16x342xbf16, #tpu.memory_space<vmem>>, vector<16x288xbf16>
    %c0_82 = arith.constant 0 : index
    %c0_83 = arith.constant 0 : index
    %67 = vector.load %arg7[%c0_82, %c0_83] : memref<16x16xbf16, #tpu.memory_space<vmem>>, vector<16x16xbf16>
    %cst_84 = arith.constant dense<0.000000e+00> : vector<16x288xf32>
    %68 = tpu.matmul %67, %66, %cst_84 {dimension_numbers = #tpu.dot_dimension_numbers<[1], [0], [0], [1], [0, 0, 1, 1], [], []>} : vector<16x16xbf16>, vector<16x288xbf16>, vector<16x288xf32> -> vector<16x288xf32>
    %c0_85 = arith.constant 0 : index
    %c0_86 = arith.constant 0 : index
    %69 = vector.load %arg8[%c0_85, %c0_86] : memref<16x1xf32, #tpu.memory_space<vmem>>, vector<16x1xf32>
    %70 = vector.broadcast %69 : vector<16x1xf32> to vector<16x288xf32>
    %71 = arith.addf %68, %70 : vector<16x288xf32>
    %cst_87 = arith.constant 0.000000e+00 : f32
    %72 = vector.broadcast %cst_87 : f32 to vector<16x288xf32>
    %73 = arith.maximumf %71, %72 : vector<16x288xf32>
    %74 = arith.truncf %73 : vector<16x288xf32> to vector<16x288xbf16>
    %c0_88 = arith.constant 0 : index
    %c0_89 = arith.constant 0 : index
    %c0_90 = arith.constant 0 : index
    %75 = vector.load %arg9[%c0_88, %c0_89, %c0_90] : memref<1x16x288xbf16, #tpu.memory_space<vmem>>, vector<1x16x288xbf16>
    %76 = vector.shape_cast %75 : vector<1x16x288xbf16> to vector<16x288xbf16>
    %77 = vector.shape_cast %74 : vector<16x288xbf16> to vector<1x16x288xbf16>
    tpu.vector_store %arg9[%c0_88, %c0_89, %c0_90], %77 {strides = array<i32>} : memref<1x16x288xbf16, #tpu.memory_space<vmem>>, vector<1x16x288xbf16>,
    return
  }
  func.func @transform_0(%arg0: i32) -> (i32, i32, i32) {
    %c0_i32 = arith.constant 0 : i32
    %c0_i32_0 = arith.constant 0 : i32
    %c0_i32_1 = arith.constant 0 : i32
    return %arg0, %c0_i32, %c0_i32_0 : i32, i32, i32
  }
  func.func @transform_1(%arg0: i32) -> (i32, i32) {
    %c0_i32 = arith.constant 0 : i32
    %c0_i32_0 = arith.constant 0 : i32
    %c0_i32_1 = arith.constant 0 : i32
    return %c0_i32, %c0_i32_0 : i32, i32
  }
  func.func @transform_2(%arg0: i32) -> (i32, i32) {
    %c0_i32 = arith.constant 0 : i32
    %c0_i32_0 = arith.constant 0 : i32
    %c0_i32_1 = arith.constant 0 : i32
    return %c0_i32, %c0_i32_0 : i32, i32
  }
  func.func @transform_3(%arg0: i32) -> (i32, i32) {
    %c0_i32 = arith.constant 0 : i32
    %c0_i32_0 = arith.constant 0 : i32
    %c0_i32_1 = arith.constant 0 : i32
    return %c0_i32, %c0_i32_0 : i32, i32
  }
  func.func @transform_4(%arg0: i32) -> (i32, i32) {
    %c0_i32 = arith.constant 0 : i32
    %c0_i32_0 = arith.constant 0 : i32
    %c0_i32_1 = arith.constant 0 : i32
    return %c0_i32, %c0_i32_0 : i32, i32
  }
  func.func @transform_5(%arg0: i32) -> (i32, i32) {
    %c0_i32 = arith.constant 0 : i32
    %c0_i32_0 = arith.constant 0 : i32
    %c0_i32_1 = arith.constant 0 : i32
    return %c0_i32, %c0_i32_0 : i32, i32
  }
  func.func @transform_6(%arg0: i32) -> (i32, i32) {
    %c0_i32 = arith.constant 0 : i32
    %c0_i32_0 = arith.constant 0 : i32
    %c0_i32_1 = arith.constant 0 : i32
    return %c0_i32, %c0_i32_0 : i32, i32
  }
  func.func @transform_7(%arg0: i32) -> (i32, i32) {
    %c0_i32 = arith.constant 0 : i32
    %c0_i32_0 = arith.constant 0 : i32
    %c0_i32_1 = arith.constant 0 : i32
    return %c0_i32, %c0_i32_0 : i32, i32
  }
  func.func @transform_8(%arg0: i32) -> (i32, i32, i32) {
    %c0_i32 = arith.constant 0 : i32
    %c0_i32_0 = arith.constant 0 : i32
    %c0_i32_1 = arith.constant 0 : i32
    return %arg0, %c0_i32, %c0_i32_0 : i32, i32, i32
  }
}

</mosaic_0001>

<bundles_post_ra>
// kernel: dimnet_plus_forward.1
= control target key start
LH: loop header
LB: loop body
LE: loop exit
PB: predicated region body
PF: predicated region fallthrough
CT: control target
= control target key end

     0   :  { %13 = vsyncpa [#allocation5], 0  ;;  %s1932_s0 = inlined_call_operand.vmem [shape: bf16[2,8,342], index: 0, kind: input, shape index: {}]   ;;  %s1933_s1 = inlined_call_operand.vmem [shape: f32[1,288], index: 1, kind: input, shape index: {}]   ;;  %s1934_s2 = inlined_call_operand.hbm [shape: bf16[16,72], index: 2, kind: input, shape index: {}]   ;;  %s1935_s3 = inlined_call_operand.vmem [shape: f32[16,1], index: 3, kind: input, shape index: {}]   ;;  %s1936_s4 = inlined_call_operand.hbm [shape: bf16[16,144], index: 4, kind: input, shape index: {}]   ;;  %s1937_s5 = inlined_call_operand.vmem [shape: f32[16,1], index: 5, kind: input, shape index: {}]   ;;  %s1938_s6 = inlined_call_operand.hbm [shape: bf16[16,16], index: 6, kind: input, shape index: {}]   ;;  %s1939_s7 = inlined_call_operand.vmem [shape: f32[16,1], index: 7, kind: input, shape index: {}]   ;;  %s1940_s8 = inlined_call_operand.vmem [shape: bf16[2,16,288], index: 8, kind: output, shape index: {}]  }
   0x1   :  { %14 = vsyncpa [#allocation7], 0  ;;  %s1616_s27 = smov 0  }
   0x2 LB: > { %s1552_s28 = smov [#allocation6]   ;;  %s1622_s30 = sadd.s32 4294967295, %s1550_s27   ;;  %s1550_s27 = sphi %s1616_s27, %s20_s27  }
   0x3   : > { %s255_s29 = sshll.u32 %s1552_s28, 4  ;;  %p1322_p0 = scmp.ge.s32.totalorder %s1550_s27, 1  ;;  %s1631_s29 = int_to_ptr.vmem [resolvable:$true] %s255_s29 }
   0x4   : > { %p224_p1 = scmp.lt.s32.totalorder %s1550_s27, 3  ;;  %p1941_p2 = scmp.eq.s32.totalorder %s1622_s30, 0 }
   0x5   : > { %s1553_s10 = smov [#allocation4]   ;;  %s1554_s13 = smov [#allocation8]  }
   0x6   : > { %p1627_p3 = pnand %p1322_p0, %p224_p1  ;;  %s239_s11 = sshll.u32 %s1553_s10, 4  ;;  %s1635_s11 = int_to_ptr.vmem [resolvable:$true] %s239_s11 }
   0x7   : > { %s1643_s14 = sshll.u32 %s1554_s13, 4  ;;  %s1452_s17 = scalar_lea.hbm %s1936_s4, 256  ;;  %s272_s14 = int_to_ptr.vmem [resolvable:$true] %s1643_s14 }
   0x8   : > { %s1943_s9 = scalar_select %p1627_p3, 1, 0 }
   0x9   : > { %p1399_p4 = pneg %p1627_p3  ;;  %p1453_p6 = scmp.ne.s32.totalorder %s1936_s4, %s1452_s17 }
   0xa   : > { %p1459_p10 = scmp.lt.u32.totalorder %s1452_s17, %s1936_s4 }
   0xb   : > { %p1639_p5 = pnand %p1941_p2, %p1399_p4 }
   0xd   : > { %p1653_p7 = pneg %p1639_p5 }
   0xf   : > { %p1455_p8 = pnand %p1653_p7, %p1453_p6 }
  0x11   : > { %p1456_p9 = pneg %p1455_p8 }
  0x13   : > { %p1461_p11 = pnand %p1459_p10, %p1456_p9 }
  0x15   : > { %1464 = shalt.err (!%p1461_p11)
}
  0x16   : > { %s1465_s23 = scalar_lea.vmem %s1631_s29, 256  ;;  %p1473_p1 = scmp.lt.s32.totalorder %s1631_s29, %s1631_s29 }
  0x17   : > { %p1466_p12 = scmp.ne.s32.totalorder %s1631_s29, %s1465_s23  ;;  %p1474_p4 = scmp.lt.s32.totalorder %s1465_s23, %s1465_s23 }
  0x19   : > { %p1468_p13 = pnand %p1466_p12, %p1653_p7  ;;  %p1475_p6 = por %p1474_p4, %p1473_p1 }
  0x1b   : > { %p1469_p0 = pneg %p1468_p13 }
  0x1d   : > { %p1476_p8 = pnand %p1475_p6, %p1469_p0 }
  0x1f   : > { %1479 = shalt.err (!%p1476_p8)
}
  0x20   : > { %s1555_s24 = smov 128   ;;  %s1556_s25 = smov 8  }
  0x21   : > { %1405 = dma.hbm_to_vmem [thread:$0]  (!%p1639_p5), %s1936_s4, 256, %s1631_s29, [#allocation7], %s1555_s24, %s1555_s24, %s1556_s25  }
  0x22   : > { %s1480_s15 = scalar_lea.hbm %s1934_s2, 128 }
  0x23   : > { %p1481_p9 = scmp.ne.s32.totalorder %s1934_s2, %s1480_s15  ;;  %p1487_p12 = scmp.lt.u32.totalorder %s1480_s15, %s1934_s2 }
  0x25   : > { %p1483_p10 = pnand %p1481_p9, %p1653_p7 }
  0x27   : > { %p1484_p11 = pneg %p1483_p10 }
  0x29   : > { %p1489_p13 = pnand %p1487_p12, %p1484_p11 }
  0x2b   : > { %1492 = shalt.err (!%p1489_p13)
}
  0x2c   : > { %s1493_s29 = scalar_lea.vmem %s1635_s11, 128  ;;  %p1501_p6 = scmp.lt.s32.totalorder %s1635_s11, %s1635_s11 }
  0x2d   : > { %p1494_p0 = scmp.ne.s32.totalorder %s1635_s11, %s1493_s29  ;;  %p1502_p8 = scmp.lt.s32.totalorder %s1493_s29, %s1493_s29 }
  0x2f   : > { %p1496_p1 = pnand %p1494_p0, %p1653_p7  ;;  %p1503_p9 = por %p1502_p8, %p1501_p6 }
  0x31   : > { %p1497_p4 = pneg %p1496_p1 }
  0x33   : > { %p1504_p10 = pnand %p1503_p9, %p1497_p4 }
  0x35   : > { %1507 = shalt.err (!%p1504_p10)
}
  0x36   : > { %s1557_s21 = smov 64   ;;  %s1558_s22 = smov 4  }
  0x37   : > { %1402 = dma.hbm_to_vmem [thread:$0]  (!%p1639_p5), %s1934_s2, 128, %s1635_s11, [#allocation5], %s1557_s21, %s1557_s21, %s1558_s22  }
  0x38   : > { %s1508_s28 = scalar_lea.hbm %s1938_s6, 128 }
  0x39   : > { %p1509_p11 = scmp.ne.s32.totalorder %s1938_s6, %s1508_s28  ;;  %p1515_p0 = scmp.lt.u32.totalorder %s1508_s28, %s1938_s6 }
  0x3b   : > { %p1511_p12 = pnand %p1509_p11, %p1653_p7 }
  0x3d   : > { %p1512_p13 = pneg %p1511_p12 }
  0x3f   : > { %p1517_p1 = pnand %p1515_p0, %p1512_p13 }
  0x41   : > { %1520 = shalt.err (!%p1517_p1)
}
  0x42   : > { %s1521_s17 = scalar_lea.vmem %s272_s14, 128  ;;  %p1529_p9 = scmp.lt.s32.totalorder %s272_s14, %s272_s14 }
  0x43   : > { %p1522_p4 = scmp.ne.s32.totalorder %s272_s14, %s1521_s17  ;;  %p1530_p10 = scmp.lt.s32.totalorder %s1521_s17, %s1521_s17 }
  0x45   : > { %p1524_p6 = pnand %p1522_p4, %p1653_p7  ;;  %p1531_p2 = por %p1530_p10, %p1529_p9 }
  0x47   : > { %p1525_p8 = pneg %p1524_p6 }
  0x49   : > { %p1532_p3 = pnand %p1531_p2, %p1525_p8 }
  0x4b   : > { %1535 = shalt.err (!%p1532_p3)
}
  0x4c   : > { %1408 = dma.hbm_to_vmem [thread:$0]  (!%p1639_p5), %s1938_s6, 128, %s272_s14, [#allocation7], %s1557_s21, %s1557_s21, %s1558_s22  }
  0x4d   : > { %p1946_p11 = scmp.ne.s32.totalorder %s1943_s9, 0 }
  0x4e   : > { %p1947_p12 = scmp.eq.s32.totalorder (!%p1946_p11), %s1622_s30, 0 }
  0x4f   : > { %298 = sbr.rel (%p1946_p11) target bundleno = 1483 (0x5cb), region = 52 }
  0x56   : > { %1541 = dma.done.wait (%p1947_p12), [#allocation5], 128   ;;  %p1948_p7 = pmov %p1947_p12 }
  0x58   : > { %1543 = vsyncadd (%p1948_p7), [#allocation5], 4294967168  ;;  %p1949_p13 = pmov %p1948_p7 }
  0x59   : > { %p1950_p2 = pmov %p1948_p7 }
  0x5a   : > { %1545 = dma.done.wait (%p1949_p13), [#allocation7], 384  }
  0x5b   : > { %1547 = vsyncadd (%p1950_p2), [#allocation7], 4294966912  ;;  %p340_p3 = scmp.lt.s32.totalorder %s1622_s30, 1  ;;  %vm353_vm0 = vcmask 703488   ;;  %v1559_v0 = vmov 0   ;;  %vm370_vm1 = vcmask 699392  }
  0x5c   : > { %354 = vst.msk [vmem:[#allocation2 + $0x10] sm:$0xff] %vm353_vm0, %v1559_v0  ;;  %351 = vst [vmem:[#allocation2] sm:$0xff] %v1559_v0  ;;  %641 = vmatprep.mubr.bf16.mxu0 %v1559_v0  ;;  %1442 = vset.pattern.permute.xlu0 %v1559_v0  ;;  %s1560_s19 = smov 126   ;;  %s1561_s29 = smov 109   ;;  %v1562_v14 = vmov 0.0   ;;  %vm378_vm2 = vcmask 257024  }
  0x5d   : > { %352 = vst [vmem:[#allocation2 + $0x8] sm:$0xff] %v1559_v0  ;;  %s1952_s30 = smov (!%p340_p3, %s1622_s30), 1  ;;  %1443 = vset.pattern.permute.xlu1 %v1559_v0  ;;  %1365 = vmatprep.subr.bf16.mxu1 %v1562_v14  ;;  %s1563_s21 = smov 127   ;;  %vm1569_vm3 = vmmov 0   ;;  %v578_v45 = vld [vmem:[%s1935_s3] sm:$0xff]  ;;  %v579_v46 = vld [vmem:[%s1935_s3 + $0x8] sm:$0xff] }
  0x5e   : > { %s1385_s9 = smul.u32 12, %s1952_s30  ;;  %s1564_s22 = smov 110   ;;  %1375 = vmatprep.mubr.msk.bf16.mxu1 %vm1569_vm3, %v1562_v14  ;;  %vm417_vm4 = vcmask 1031168   ;;  %vm462_vm5 = vcmask 891904   ;;  %vm395_vm6 = vcmask 1039360   ;;  %vm403_vm7 = vcmask 261124  }
  0x5f   : > { %s1565_s23 = smov 108   ;;  %s1566_s24 = smov 92   ;;  %vm441_vm8 = vcmask 900096   ;;  %vm486_vm9 = vcmask 883712   ;;  %vm507_vm10 = vcmask 752640   ;;  %vm531_vm11 = vcmask 744448  }
  0x60   : > { %s344_s20 = scalar_lea.vmem %s1932_s0, %s1385_s9  ;;  %s1567_s25 = smov 91   ;;  %vm552_vm12 = vcmask 736256   ;;  %vm599_vm13 = vcmask 1043456   ;;  %vm595_vm14 = vcmask 588800   ;;  %vm739_vm15 = vcmask 1047704  }
  0x61   : > { %v1444_v1 = vld [vmem:[%s344_s20 + $0x8] ss:$0 sps:$4 sm:$0xff]   ;;  %v355_v2 = vld [vmem:[%s344_s20] sm:$0xff]  ;;  %s1568_s26 = smov 90   ;;  %s1570_s11 = smov 19   ;;  %vm733_vm0 = vcmask 154624  }
  0x62   : > { %v1334_v3 = vcombine.high %v355_v2, %v355_v2  ;;  %v1333_v4 = vcombine.low %v355_v2, %v355_v2  ;;  %371 = vst.msk [vmem:[#allocation2 + $0x10] sm:$0xf] %vm370_vm1, %v1444_v1  ;;  %vm742_vm1 = vcmask 416768  }
  0x64   : > { %369 = vst [vmem:[#allocation2 + $0x8] sm:$0xf] %v1334_v3  ;;  %368 = vst [vmem:[#allocation2] sm:$0xf] %v1333_v4 }
  0x69   : > { %v407_v5 = vld [vmem:[#allocation2 + $0x10] sm:$0xf] }
  0x6a   : > { %415 = vrot.lane.b32.xlu0 %v407_v5, %s1560_s19  ;;  %v452_v7 = vld [vmem:[#allocation2 + $0x10] sm:$0xf] }
  0x6b   : > { %v406_v6 = vld [vmem:[#allocation2 + $0x8] sm:$0xf]  ;;  %v405_v9 = vld [vmem:[#allocation2] sm:$0xf]  ;;  %v382_v11 = vld [vmem:[#allocation2 + $0x10] sm:$0xf] }
  0x6c   : > { %413 = vrot.lane.b32.xlu1 %v406_v6, %s1560_s19  ;;  %v381_v8 = vld [vmem:[#allocation2 + $0x8] sm:$0xf]  ;;  %v380_v13 = vld [vmem:[#allocation2] sm:$0xf]  ;;  %v388_v15 = vrot.slane %v382_v11, 4 }
  0x6d   : > { %v387_v10 = vrot.slane %v381_v8, 4  ;;  %v451_v12 = vld [vmem:[#allocation2 + $0x8] sm:$0xf]  ;;  %v386_v16 = vrot.slane %v380_v13, 4  ;;  %v428_v17 = vld [vmem:[#allocation2 + $0x10] sm:$0xf] }
  0x6e   : > { %460 = vrot.lane.b32.xlu0 %v452_v7, %s1561_s29  ;;  %v427_v18 = vld [vmem:[#allocation2 + $0x8] sm:$0xf]  ;;  %v375_v19 = vld [vmem:[#allocation2 + $0x10] sm:$0xf]  ;;  %v373_v21 = vld [vmem:[#allocation2] sm:$0xf] }
  0x6f   : > { %v374_v20 = vld [vmem:[#allocation2 + $0x8] sm:$0xf]  ;;  %379 = vst.msk [vmem:[#allocation3 + $0x10] sm:$0xf] %vm378_vm2, %v375_v19  ;;  %376 = vst [vmem:[#allocation3] sm:$0xf] %v373_v21 }
  0x70   : > { %411 = vrot.lane.b32.xlu1 %v405_v9, %s1560_s19  ;;  %377 = vst [vmem:[#allocation3 + $0x8] sm:$0xf] %v374_v20  ;;  %v434_v22 = vrot.slane %v428_v17, 4  ;;  %v433_v23 = vrot.slane %v427_v18, 4  ;;  %v426_v24 = vld [vmem:[#allocation2] sm:$0xf] }
  0x71   : > { %v472_v25 = vld [vmem:[#allocation2 + $0x8] sm:$0xf]  ;;  %v432_v26 = vrot.slane %v426_v24, 4  ;;  %v473_v28 = vld [vmem:[#allocation2 + $0x10] sm:$0xf] }
  0x72   : > { %391 = vrot.lane.b32.xlu0 %v387_v10, %s1563_s21  ;;  %v478_v27 = vrot.slane %v472_v25, 4  ;;  %v479_v29 = vrot.slane %v473_v28, 4  ;;  %v471_v30 = vld [vmem:[#allocation2] sm:$0xf]  ;;  %v496_v33 = vld [vmem:[#allocation2 + $0x8] sm:$0xf] }
  0x73   : > { %v450_v31 = vld [vmem:[#allocation2] sm:$0xf]  ;;  %v477_v32 = vrot.slane %v471_v30, 4  ;;  %v517_v34 = vld [vmem:[#allocation2 + $0x8] sm:$0xf] }
  0x74   : > { %458 = vrot.lane.b32.xlu1 %v451_v12, %s1561_s29  ;;  %v497_v35 = vld [vmem:[#allocation2 + $0x10] sm:$0xf]  ;;  %v523_v36 = vrot.slane %v517_v34, 4  ;;  %v516_v39 = vld [vmem:[#allocation2] sm:$0xf] }
  0x75   : > { %v518_v37 = vld [vmem:[#allocation2 + $0x10] sm:$0xf]  ;;  %v495_v40 = vld [vmem:[#allocation2] sm:$0xf]  ;;  %v522_v41 = vrot.slane %v516_v39, 4 }
  0x76   : > { %393 = vrot.lane.b32.xlu0 %v388_v15, %s1563_s21  ;;  %v524_v38 = vrot.slane %v518_v37, 4  ;;  %v540_v42 = vld [vmem:[#allocation2] sm:$0xf]  ;;  %v541_v43 = vld [vmem:[#allocation2 + $0x8] sm:$0xf] }
  0x77   : > { %v542_v44 = vld [vmem:[#allocation2 + $0x10] sm:$0xf] }
  0x78   : > { %389 = vrot.lane.b32.xlu1 %v386_v16, %s1563_s21 }
  0x7a   : > { %439 = vrot.lane.b32.xlu0 %v434_v22, %s1564_s22 }
  0x7c   : > { %437 = vrot.lane.b32.xlu1 %v433_v23, %s1564_s22 }
  0x7e   : > { %435 = vrot.lane.b32.xlu0 %v432_v26, %s1564_s22 }
  0x80   : > { %482 = vrot.lane.b32.xlu1 %v478_v27, %s1565_s23 }
  0x82   : > { %484 = vrot.lane.b32.xlu0 %v479_v29, %s1565_s23 }
  0x84   : > { %456 = vrot.lane.b32.xlu1 %v450_v31, %s1561_s29 }
  0x86   : > { %480 = vrot.lane.b32.xlu0 %v477_v32, %s1565_s23 }
  0x88   : > { %503 = vrot.lane.b32.xlu1 %v496_v33, %s1566_s24 }
  0x8a   : > { %505 = vrot.lane.b32.xlu0 %v497_v35, %s1566_s24 }
  0x8c   : > { %527 = vrot.lane.b32.xlu1 %v523_v36, %s1567_s25 }
  0x8e   : > { %529 = vrot.lane.b32.xlu0 %v524_v38, %s1567_s25 }
  0x90   : > { %501 = vrot.lane.b32.xlu1 %v495_v40, %s1566_s24 }
  0x92   : > { %525 = vrot.lane.b32.xlu0 %v522_v41, %s1567_s25 }
  0x94   : > { %546 = vrot.lane.b32.xlu1 %v540_v42, %s1568_s26  ;;  %v1447_v42 = vld [vmem:[#allocation4] sm:$0xff]  }
  0x96   : > { %548 = vrot.lane.b32.xlu0 %v541_v43, %s1568_s26  ;;  %v700_v43 = vlaneseq }
  0x98   : > { %550 = vrot.lane.b32.xlu1 %v542_v44, %s1568_s26  ;;  %v701_v44 = vshrl.u32 %v700_v43, 7 }
  0x9a   : > { %582 = vperm.xlu0 %1442, %v578_v45   ;;  %v710_v45 = vsub.s32 2, %v701_v44 }
  0x9c   : > { %587 = vperm.xlu1 %1443, %v579_v46  }
  0xdc   : > { %v416_v47 = vpop.permute.xlu0 %415 }
  0xdd   : > { %425 = vst.msk [vmem:[#allocation3 + $0x28] sm:$0xf] %vm378_vm2, %v416_v47 }
  0xde   : > { %v414_v48 = vpop.permute.xlu1 %413 }
  0xdf   : > { %v419_v49 = vsel %vm417_vm4, %v414_v48, %v416_v47  ;;  %v372_v47 = vld [vmem:[%s1933_s1] sm:$0x7] }
  0xe0   : > { %424 = vst [vmem:[#allocation3 + $0x20] sm:$0xf] %v419_v49  ;;  %v461_v50 = vpop.permute.xlu0 %460 }
  0xe1   : > { %470 = vst.msk [vmem:[#allocation3 + $0x40] sm:$0xf] %vm378_vm2, %v461_v50 }
  0xe2   : > { %v412_v51 = vpop.permute.xlu1 %411 }
  0xe3   : > { %v418_v52 = vsel %vm417_vm4, %v412_v51, %v414_v48  ;;  %v702_v48 = vsub.s32 0, %v701_v44 }
  0xe4   : > { %423 = vst [vmem:[#allocation3 + $0x18] sm:$0xf] %v418_v52  ;;  %v392_v53 = vpop.permute.xlu0 %391 }
  0xe6   : > { %v459_v54 = vpop.permute.xlu1 %458 }
  0xe7   : > { %v464_v55 = vsel %vm462_vm5, %v459_v54, %v461_v50  ;;  %v706_v50 = vsub.s32 1, %v701_v44 }
  0xe8   : > { %469 = vst [vmem:[#allocation3 + $0x38] sm:$0xf] %v464_v55  ;;  %v394_v56 = vpop.permute.xlu0 %393 }
  0xe9   : > { %v397_v57 = vsel %vm395_vm6, %v392_v53, %v394_v56  ;;  %404 = vst.msk [vmem:[#allocation3 + $0x10] sm:$0xf0] %vm403_vm7, %v394_v56 }
  0xea   : > { %v390_v58 = vpop.permute.xlu1 %389  ;;  %402 = vst [vmem:[#allocation3 + $0x8] sm:$0xf0] %v397_v57 }
  0xeb   : > { %v396_v59 = vsel %vm395_vm6, %v390_v58, %v392_v53 }
  0xec   : > { %401 = vst [vmem:[#allocation3] sm:$0xf0] %v396_v59  ;;  %v440_v60 = vpop.permute.xlu0 %439 }
  0xed   : > { %449 = vst.msk [vmem:[#allocation3 + $0x28] sm:$0xf0] %vm403_vm7, %v440_v60 }
  0xee   : > { %v438_v61 = vpop.permute.xlu1 %437 }
  0xef   : > { %v443_v62 = vsel %vm441_vm8, %v438_v61, %v440_v60 }
  0xf0   : > { %448 = vst [vmem:[#allocation3 + $0x20] sm:$0xf0] %v443_v62  ;;  %v436_v63 = vpop.permute.xlu0 %435  ;;  %v563_v1 = vld [vmem:[#allocation3 + $0x10] sm:$0xff] }
  0xf1   : > { %v442_v2 = vsel %vm441_vm8, %v436_v63, %v438_v61  ;;  %1366 = vmatpush3.bf16.msra.mxu1 %v563_v1  ;;  %v562_v4 = vld [vmem:[#allocation3 + $0x8] sm:$0xff] }
  0xf2   : > { %v483_v3 = vpop.permute.xlu1 %482  ;;  %447 = vst [vmem:[#allocation3 + $0x18] sm:$0xf0] %v442_v2  ;;  %609 = vmatprep.subr.bf16.mxu0 %v562_v4  ;;  %1367 = vmatprep.subr.bf16.mxu1 %v1562_v14  ;;  %v1808_v2 = vrot.slane %v372_v47, %v702_v48 }
  0xf3   : > { %v561_v5 = vld [vmem:[#allocation3] sm:$0xff] }
  0xf4   : > { %610 = vmatpush1.bf16.msra.mxu0 %v561_v5  ;;  %v485_v6 = vpop.permute.xlu0 %484  ;;  %v566_v7 = vld [vmem:[#allocation3 + $0x28] sm:$0xff] }
  0xf5   : > { %v488_v8 = vsel %vm486_vm9, %v483_v3, %v485_v6  ;;  %494 = vst.msk [vmem:[#allocation3 + $0x40] sm:$0xf0] %vm403_vm7, %v485_v6  ;;  %1368 = vmatpush3.bf16.msra.mxu1 %v566_v7 }
  0xf6   : > { %v457_v9 = vpop.permute.xlu1 %456  ;;  %493 = vst [vmem:[#allocation3 + $0x38] sm:$0xf0] %v488_v8  ;;  %1369 = vmatprep.subr.bf16.mxu1 %v1562_v14 }
  0xf7   : > { %v463_v10 = vsel %vm462_vm5, %v457_v9, %v459_v54  ;;  %v565_v11 = vld [vmem:[#allocation3 + $0x20] sm:$0xff]  ;;  %v1806_v54 = vrot.slane %v372_v47, %v710_v45 }
  0xf8   : > { %468 = vst [vmem:[#allocation3 + $0x30] sm:$0xf] %v463_v10  ;;  %611 = vmatprep.subr.bf16.mxu0 %v565_v11  ;;  %v481_v12 = vpop.permute.xlu0 %480 }
  0xf9   : > { %v487_v13 = vsel %vm486_vm9, %v481_v12, %v483_v3  ;;  %v564_v16 = vld [vmem:[#allocation3 + $0x18] sm:$0xff]  ;;  %v1810_v3 = vrot.slane %v372_v47, %v706_v50 }
  0xfa   : > { %v504_v15 = vpop.permute.xlu1 %503  ;;  %492 = vst [vmem:[#allocation3 + $0x30] sm:$0xf0] %v487_v13  ;;  %612 = vmatpush1.bf16.msra.mxu0 %v564_v16 }
  0xfc   : > { %v506_v17 = vpop.permute.xlu0 %505  ;;  %v569_v18 = vld [vmem:[#allocation3 + $0x40] sm:$0xff] }
  0xfd   : > { %v509_v19 = vsel %vm507_vm10, %v504_v15, %v506_v17  ;;  %515 = vst.msk [vmem:[#allocation3 + $0x58] sm:$0xf] %vm378_vm2, %v506_v17  ;;  %1370 = vmatpush3.bf16.msra.mxu1 %v569_v18  ;;  %v568_v21 = vld [vmem:[#allocation3 + $0x38] sm:$0xff] }
  0xfe   : > { %v528_v20 = vpop.permute.xlu1 %527  ;;  %514 = vst [vmem:[#allocation3 + $0x50] sm:$0xf] %v509_v19  ;;  %613 = vmatprep.subr.bf16.mxu0 %v568_v21  ;;  %1371 = vmatprep.subr.bf16.mxu1 %v1562_v14 }
 0x100   : > { %v530_v22 = vpop.permute.xlu0 %529 }
 0x101   : > { %v533_v23 = vsel %vm531_vm11, %v528_v20, %v530_v22  ;;  %539 = vst.msk [vmem:[#allocation3 + $0x58] sm:$0xf0] %vm403_vm7, %v530_v22  ;;  %v567_v25 = vld [vmem:[#allocation3 + $0x30] sm:$0xff]  ;;  %vm749_vm7 = vcmask 261120  }
 0x102   : > { %v502_v24 = vpop.permute.xlu1 %501  ;;  %538 = vst [vmem:[#allocation3 + $0x50] sm:$0xf0] %v533_v23  ;;  %614 = vmatpush1.bf16.msra.mxu0 %v567_v25 }
 0x103   : > { %v508_v26 = vsel %vm507_vm10, %v502_v24, %v504_v15 }
 0x104   : > { %513 = vst [vmem:[#allocation3 + $0x48] sm:$0xf] %v508_v26  ;;  %v526_v27 = vpop.permute.xlu0 %525 }
 0x105   : > { %v532_v28 = vsel %vm531_vm11, %v526_v27, %v528_v20 }
 0x106   : > { %v547_v29 = vpop.permute.xlu1 %546  ;;  %537 = vst [vmem:[#allocation3 + $0x48] sm:$0xf0] %v532_v28 }
 0x108   : > { %v549_v30 = vpop.permute.xlu0 %548  ;;  %v572_v31 = vld [vmem:[#allocation3 + $0x58] sm:$0xff] }
 0x109   : > { %v553_v32 = vsel %vm552_vm12, %v547_v29, %v549_v30  ;;  %1372 = vmatpush3.bf16.msra.mxu1 %v572_v31  ;;  %v571_v34 = vld [vmem:[#allocation3 + $0x50] sm:$0xff]  ;;  %v1448_v29 = vld [vmem:[#allocation6 + $0x4] ss:$8 sps:$4 sm:$0xff]  }
 0x10a   : > { %v551_v33 = vpop.permute.xlu1 %550  ;;  %558 = vst [vmem:[#allocation3 + $0x60] sm:$0xf] %v553_v32  ;;  %615 = vmatprep.subr.bf16.mxu0 %v571_v34  ;;  %1373 = vmatprep.subr.bf16.mxu1 %v1562_v14  ;;  %v941_v31 = vld [vmem:[%s1937_s5 + $0x8] sm:$0xff] }
 0x10b   : > { %v554_v35 = vsel %vm552_vm12, %v549_v30, %v551_v33  ;;  %560 = vst.msk [vmem:[#allocation3 + $0x70] sm:$0xf] %vm378_vm2, %v551_v33  ;;  %v940_v30 = vld [vmem:[%s1937_s5] sm:$0xff] }
 0x10c   : > { %559 = vst [vmem:[#allocation3 + $0x68] sm:$0xf] %v554_v35 }
 0x10d   : > { %v570_v36 = vld [vmem:[#allocation3 + $0x48] sm:$0xff] }
 0x10e   : > { %616 = vmatpush1.bf16.msra.mxu0 %v570_v36 }
 0x111   : > { %v573_v38 = vld [vmem:[#allocation3 + $0x60] sm:$0xf] }
 0x112   : > { %v575_v37 = vld [vmem:[#allocation3 + $0x70] sm:$0xf]  ;;  %v601_v41 = vsel %vm599_vm13, %v573_v38, 0 }
 0x113   : > { %v574_v39 = vld [vmem:[#allocation3 + $0x68] sm:$0xf]  ;;  %v607_v40 = vsel %vm599_vm13, %v575_v37, 0 }
 0x114   : > { %1337 = vmatprep.subr.msk.bf16.mxu0 %vm599_vm13, %v574_v39  ;;  %1374 = vmatpush3.bf16.msra.mxu1 %v607_v40  ;;  %vm961_vm13 = vcmask 130048  }
 0x115   : > { %618 = vmatpush1.bf16.msra.mxu0 %v601_v41  ;;  %1008 = vmatprep.subr.bf16.mxu1 %v1559_v0 }
 0x117   : > { %1376 = vmatmul.mubr.msk.bf16.vlgmr.msra.gmra.mrb[0].mxu1 %vm595_vm14, %v1447_v42 }
 0x118   : > { %1338 = vmatmul.mubr.msk.bf16.vlgmr.msra.gmra.mrb[0].mxu0 %vm595_vm14, %v1447_v42  ;;  %1343 = vmatprep.mubr.msk.bf16.mxu1 %vm961_vm13, %v1448_v29 }
 0x119   : > { %v583_v46 = vpop.permute.xlu0 %582  ;;  %1342 = vmatprep.mubr.msk.bf16.mxu0 %vm961_vm13, %v1448_v29 }
 0x11b   : > { %v588_v51 = vpop.permute.xlu1 %587 }
 0x1ea   : > { %v686_v49 = vpop.f32.mrb[0].mxu1 }
 0x1eb   : > { %v643_v52 = vpop.f32.mrb[0].mxu0  ;;  %v687_v53 = vadd.f32 %v686_v49, %v583_v46  ;;  %v1377_v55 = vpop.f32.mrb[1].mxu1 }
 0x1ec   : > { %v644_v56 = vadd.f32 %v643_v52, %v583_v46  ;;  %v645_v57 = vpop.f32.mrb[1].mxu0  ;;  %v689_v58 = vpop.f32.mrb[2].mxu1 }
 0x1ed   : > { %v695_v59 = vmax.f32 %v687_v53, 0.0  ;;  %v646_v60 = vadd.f32 %v645_v57, %v583_v46  ;;  %v690_v61 = vadd.f32 %v689_v58, %v588_v51  ;;  %v647_v62 = vpop.f32.mrb[2].mxu0  ;;  %v1378_v63 = vpop.f32.mrb[3].mxu1 }
 0x1ee   : > { %v693_v1 = vmax.f32 %v644_v56, 0.0  ;;  %v648_v4 = vadd.f32 %v647_v62, %v588_v51  ;;  %v649_v5 = vpop.f32.mrb[3].mxu0 }
 0x1ef   : > { %v717_v6 = vmul.f32 %v1806_v54, %v695_v59  ;;  %v694_v7 = vmax.f32 %v646_v60, 0.0  ;;  %v698_v8 = vmax.f32 %v690_v61, 0.0  ;;  %v650_v9 = vadd.f32 %v649_v5, %v588_v51 }
 0x1f0   : > { %v696_v10 = vmax.f32 %v648_v4, 0.0  ;;  %v715_v13 = vmul.f32 %v1808_v2, %v693_v1 }
 0x1f1   : > { %v697_v11 = vmax.f32 %v650_v9, 0.0  ;;  %v720_v12 = vmul.f32 %v1806_v54, %v698_v8  ;;  %v716_v16 = vmul.f32 %v1810_v3, %v694_v7 }
 0x1f2   : > { %v718_v15 = vmul.f32 %v1808_v2, %v696_v10 }
 0x1f3   : > { %v719_v17 = vmul.f32 %v1810_v3, %v697_v11  ;;  %v723_v18 = vpack.c.bf16 %v720_v12, %v717_v6 }
 0x1f4   : > { %v721_v19 = vpack.c.bf16 %v718_v15, %v715_v13 }
 0x1f5   : > { %v722_v20 = vpack.c.bf16 %v719_v17, %v716_v16 }
 0x1f6   : > { %727 = vrot.lane.b32.xlu1 %v721_v19, %s1570_s11  ;;  %v1450_v19 = vld [vmem:[#allocation6] ss:$8 sps:$4 sm:$0xff]  }
 0x1f7   : > { %729 = vrot.lane.b32.xlu0 %v722_v20, %s1570_s11 }
 0x1fa   : > { %731 = vrot.lane.b32.xlu1 %v723_v18, %s1570_s11 }
 0x268   : > { %v728_v21 = vpop.permute.xlu1 %727 }
 0x269   : > { %v730_v22 = vpop.permute.xlu0 %729  ;;  %740 = vst.msk [vmem:[#allocation2] sm:$0xff] %vm739_vm15, %v728_v21 }
 0x26a   : > { %v734_v23 = vsel %vm733_vm0, %v728_v21, %v730_v22 }
 0x26b   : > { %748 = vst [vmem:[#allocation3 + $0x8] sm:$0xff] %v734_v23  ;;  %965 = vmatprep.subr.bf16.mxu0 %v734_v23 }
 0x26c   : > { %v732_v24 = vpop.permute.xlu1 %731 }
 0x26d   : > { %v735_v25 = vsel %vm733_vm0, %v730_v22, %v732_v24 }
 0x26e   : > { %743 = vst.msk [vmem:[#allocation2 + $0x10] sm:$0xff] %vm742_vm1, %v735_v25 }
 0x270   : > { %v771_v26 = vld [vmem:[#allocation2] sm:$0xff] }
 0x271   : > { %777 = vrot.lane.b32.xlu1 %v771_v26, %s1560_s19  ;;  %757 = vrot.lane.b32.xlu0 %v771_v26, %s1563_s21  ;;  %747 = vst [vmem:[#allocation3] sm:$0xff] %v771_v26 }
 0x272   : > { %966 = vmatpush1.bf16.msra.mxu0 %v771_v26 }
 0x275   : > { %817 = vrot.lane.b32.xlu1 %v771_v26, %s1561_s29  ;;  %797 = vrot.lane.b32.xlu0 %v771_v26, %s1564_s22  ;;  %v753_v27 = vld [vmem:[#allocation2 + $0x10] sm:$0xff] }
 0x276   : > { %750 = vst.msk [vmem:[#allocation3 + $0x10] sm:$0xff] %vm749_vm7, %v753_v27 }
 0x279   : > { %857 = vrot.lane.b32.xlu1 %v771_v26, %s1566_s24  ;;  %837 = vrot.lane.b32.xlu0 %v771_v26, %s1565_s23 }
 0x27d   : > { %877 = vrot.lane.b32.xlu0 %v771_v26, %s1567_s25  ;;  %761 = vrot.lane.b32.xlu1 %v753_v27, %s1563_s21  ;;  %v913_v28 = vld [vmem:[#allocation3 + $0x10] sm:$0xff] }
 0x27e   : > { %1009 = vmatpush1.bf16.msra.mxu1 %v913_v28 }
 0x27f   : > { %1010 = vmatprep.subr.bf16.mxu1 %v1559_v0 }
 0x281   : > { %759 = vrot.lane.b32.xlu0 %v734_v23, %s1563_s21  ;;  %779 = vrot.lane.b32.xlu1 %v734_v23, %s1560_s19 }
 0x285   : > { %781 = vrot.lane.b32.xlu0 %v753_v27, %s1560_s19  ;;  %801 = vrot.lane.b32.xlu1 %v753_v27, %s1564_s22 }
 0x289   : > { %799 = vrot.lane.b32.xlu0 %v734_v23, %s1564_s22  ;;  %819 = vrot.lane.b32.xlu1 %v734_v23, %s1561_s29 }
 0x28d   : > { %821 = vrot.lane.b32.xlu0 %v753_v27, %s1561_s29  ;;  %841 = vrot.lane.b32.xlu1 %v753_v27, %s1565_s23 }
 0x291   : > { %839 = vrot.lane.b32.xlu0 %v734_v23, %s1565_s23  ;;  %859 = vrot.lane.b32.xlu1 %v734_v23, %s1566_s24 }
 0x295   : > { %861 = vrot.lane.b32.xlu0 %v753_v27, %s1566_s24  ;;  %881 = vrot.lane.b32.xlu1 %v753_v27, %s1567_s25 }
 0x299   : > { %879 = vrot.lane.b32.xlu0 %v734_v23, %s1567_s25  ;;  %899 = vrot.lane.b32.xlu1 %v734_v23, %s1568_s26 }
 0x29d   : > { %901 = vrot.lane.b32.xlu0 %v753_v27, %s1568_s26  ;;  %897 = vrot.lane.b32.xlu1 %v771_v26, %s1568_s26 }
 0x2a1   : > { %944 = vperm.xlu0 %1442, %v940_v30   ;;  %949 = vperm.xlu1 %1443, %v941_v31  }
 0x2e3   : > { %v758_v32 = vpop.permute.xlu0 %757  ;;  %v778_v33 = vpop.permute.xlu1 %777 }
 0x2e7   : > { %v798_v34 = vpop.permute.xlu0 %797  ;;  %v818_v35 = vpop.permute.xlu1 %817 }
 0x2eb   : > { %v838_v36 = vpop.permute.xlu0 %837  ;;  %v858_v37 = vpop.permute.xlu1 %857 }
 0x2ef   : > { %v1859_v38 = vpop.permute.xlu0 %877  ;;  %v762_v39 = vpop.permute.xlu1 %761 }
 0x2f0   : > { %770 = vst.msk [vmem:[#allocation3 + $0x28] sm:$0xff] %vm749_vm7, %v762_v39 }
 0x2f3   : > { %v760_v40 = vpop.permute.xlu0 %759  ;;  %v780_v41 = vpop.permute.xlu1 %779 }
 0x2f4   : > { %v763_v42 = vsel %vm395_vm6, %v758_v32, %v760_v40  ;;  %v764_v43 = vsel %vm395_vm6, %v760_v40, %v762_v39  ;;  %v783_v44 = vsel %vm417_vm4, %v778_v33, %v780_v41 }
 0x2f5   : > { %768 = vst [vmem:[#allocation3 + $0x18] sm:$0xff] %v763_v42  ;;  %769 = vst [vmem:[#allocation3 + $0x20] sm:$0xff] %v764_v43  ;;  %967 = vmatprep.subr.bf16.mxu0 %v764_v43 }
 0x2f6   : > { %788 = vst [vmem:[#allocation3 + $0x30] sm:$0xff] %v783_v44  ;;  %968 = vmatpush1.bf16.msra.mxu0 %v763_v42 }
 0x2f7   : > { %v782_v45 = vpop.permute.xlu0 %781  ;;  %v802_v46 = vpop.permute.xlu1 %801  ;;  %v916_v47 = vld [vmem:[#allocation3 + $0x28] sm:$0xff] }
 0x2f8   : > { %v784_v48 = vsel %vm417_vm4, %v780_v41, %v782_v45  ;;  %790 = vst.msk [vmem:[#allocation3 + $0x40] sm:$0xff] %vm749_vm7, %v782_v45  ;;  %810 = vst.msk [vmem:[#allocation3 + $0x58] sm:$0xff] %vm749_vm7, %v802_v46  ;;  %1011 = vmatpush1.bf16.msra.mxu1 %v916_v47 }
 0x2f9   : > { %789 = vst [vmem:[#allocation3 + $0x38] sm:$0xff] %v784_v48  ;;  %1012 = vmatprep.subr.bf16.mxu1 %v1559_v0  ;;  %969 = vmatprep.subr.bf16.mxu0 %v784_v48 }
 0x2fa   : > { %970 = vmatpush1.bf16.msra.mxu0 %v783_v44 }
 0x2fb   : > { %v800_v49 = vpop.permute.xlu0 %799  ;;  %v820_v50 = vpop.permute.xlu1 %819 }
 0x2fc   : > { %v803_v51 = vsel %vm441_vm8, %v798_v34, %v800_v49  ;;  %v804_v52 = vsel %vm441_vm8, %v800_v49, %v802_v46  ;;  %v823_v53 = vsel %vm462_vm5, %v818_v35, %v820_v50 }
 0x2fd   : > { %808 = vst [vmem:[#allocation3 + $0x48] sm:$0xff] %v803_v51  ;;  %809 = vst [vmem:[#allocation3 + $0x50] sm:$0xff] %v804_v52  ;;  %971 = vmatprep.subr.bf16.mxu0 %v804_v52 }
 0x2fe   : > { %828 = vst [vmem:[#allocation3 + $0x60] sm:$0xff] %v823_v53  ;;  %972 = vmatpush1.bf16.msra.mxu0 %v803_v51 }
 0x2ff   : > { %v822_v55 = vpop.permute.xlu0 %821  ;;  %v842_v56 = vpop.permute.xlu1 %841  ;;  %v919_v57 = vld [vmem:[#allocation3 + $0x40] sm:$0xff]  ;;  %v922_v61 = vld [vmem:[#allocation3 + $0x58] sm:$0xff] }
 0x300   : > { %v824_v58 = vsel %vm462_vm5, %v820_v50, %v822_v55  ;;  %830 = vst.msk [vmem:[#allocation3 + $0x70] sm:$0xff] %vm749_vm7, %v822_v55  ;;  %850 = vst.msk [vmem:[#allocation3 + $0x88] sm:$0xff] %vm749_vm7, %v842_v56  ;;  %1013 = vmatpush1.bf16.msra.mxu1 %v919_v57  ;;  %v1086_v57 = vld [vmem:[%s1939_s7] sm:$0xff] }
 0x301   : > { %829 = vst [vmem:[#allocation3 + $0x68] sm:$0xff] %v824_v58  ;;  %1014 = vmatprep.subr.bf16.mxu1 %v1559_v0  ;;  %973 = vmatprep.subr.bf16.mxu0 %v824_v58 }
 0x302   : > { %974 = vmatpush1.bf16.msra.mxu0 %v823_v53 }
 0x303   : > { %v840_v59 = vpop.permute.xlu0 %839  ;;  %v860_v60 = vpop.permute.xlu1 %859 }
 0x304   : > { %v843_v62 = vsel %vm486_vm9, %v838_v36, %v840_v59  ;;  %v844_v63 = vsel %vm486_vm9, %v840_v59, %v842_v56  ;;  %v863_v1 = vsel %vm507_vm10, %v858_v37, %v860_v60  ;;  %1015 = vmatpush1.bf16.msra.mxu1 %v922_v61  ;;  %v1451_v61 = vld [vmem:[#allocation8] sm:$0xff]  }
 0x305   : > { %1016 = vmatprep.subr.bf16.mxu1 %v1559_v0  ;;  %975 = vmatprep.subr.bf16.mxu0 %v844_v63 }
 0x306   : > { %976 = vmatpush1.bf16.msra.mxu0 %v843_v62 }
 0x307   : > { %v862_v4 = vpop.permute.xlu0 %861  ;;  %v882_v5 = vpop.permute.xlu1 %881  ;;  %v925_v6 = vld [vmem:[#allocation3 + $0x70] sm:$0xff]  ;;  %v928_v10 = vld [vmem:[#allocation3 + $0x88] sm:$0xff] }
 0x308   : > { %v864_v7 = vsel %vm507_vm10, %v860_v60, %v862_v4  ;;  %870 = vst.msk [vmem:[#allocation3 + $0xa0] sm:$0xff] %vm749_vm7, %v862_v4  ;;  %890 = vst.msk [vmem:[#allocation3 + $0xb8] sm:$0xff] %vm749_vm7, %v882_v5  ;;  %1017 = vmatpush1.bf16.msra.mxu1 %v925_v6 }
 0x309   : > { %1018 = vmatprep.subr.bf16.mxu1 %v1559_v0  ;;  %977 = vmatprep.subr.bf16.mxu0 %v864_v7 }
 0x30a   : > { %978 = vmatpush1.bf16.msra.mxu0 %v863_v1 }
 0x30b   : > { %v880_v8 = vpop.permute.xlu0 %879  ;;  %v900_v9 = vpop.permute.xlu1 %899 }
 0x30c   : > { %v883_v11 = vsel %vm531_vm11, %v1859_v38, %v880_v8  ;;  %v884_v12 = vsel %vm531_vm11, %v880_v8, %v882_v5  ;;  %1019 = vmatpush1.bf16.msra.mxu1 %v928_v10 }
 0x30d   : > { %1020 = vmatprep.subr.bf16.mxu1 %v1559_v0  ;;  %979 = vmatprep.subr.bf16.mxu0 %v884_v12 }
 0x30e   : > { %980 = vmatpush1.bf16.msra.mxu0 %v883_v11 }
 0x30f   : > { %v902_v13 = vpop.permute.xlu0 %901  ;;  %v898_v15 = vpop.permute.xlu1 %897  ;;  %v931_v16 = vld [vmem:[#allocation3 + $0xa0] sm:$0xff]  ;;  %v934_v20 = vld [vmem:[#allocation3 + $0xb8] sm:$0xff] }
 0x310   : > { %v904_v17 = vsel %vm552_vm12, %v900_v9, %v902_v13  ;;  %910 = vst.msk [vmem:[#allocation3 + $0xd0] sm:$0xff] %vm749_vm7, %v902_v13  ;;  %v903_v18 = vsel %vm552_vm12, %v898_v15, %v900_v9  ;;  %1021 = vmatpush1.bf16.msra.mxu1 %v931_v16 }
 0x311   : > { %1022 = vmatprep.subr.bf16.mxu1 %v1559_v0  ;;  %981 = vmatprep.subr.bf16.mxu0 %v904_v17 }
 0x312   : > { %982 = vmatpush1.bf16.msra.mxu0 %v903_v18 }
 0x314   : > { %1023 = vmatpush1.bf16.msra.mxu1 %v934_v20 }
 0x315   : > { %1024 = vmatprep.subr.bf16.mxu1 %v1559_v0  ;;  %998 = vmatmul.mubr.bf16.vlgmr.msra.gmra.mrb[4].mxu0 %v1450_v19 }
 0x316   : > { %1152 = vmatprep.mubr.bf16.mxu0 %v1559_v0 }
 0x317   : > { %v937_v21 = vld [vmem:[#allocation3 + $0xd0] sm:$0xff] }
 0x318   : > { %1025 = vmatpush1.bf16.msra.mxu1 %v937_v21 }
 0x319   : > { %1379 = vmatprep.subr.bf16.mxu1 %v1562_v14 }
 0x31b   : > { %1041 = vmatmul.mubr.bf16.vlgmr.msra.gmra.mrb[4].mxu1 %v1450_v19 }
 0x31c   : > { %1381 = vmatprep.mubr.msk.bf16.mxu1 %vm1569_vm3, %v1562_v14 }
 0x320   : > { %v945_v22 = vpop.permute.xlu0 %944  ;;  %v950_v26 = vpop.permute.xlu1 %949 }
 0x3e8   : > { %v999_v23 = vpop.f32.mrb[4].mxu0 }
 0x3e9   : > { %v1000_v24 = vadd.f32 %v999_v23, %v945_v22  ;;  %v1001_v25 = vpop.f32.mrb[5].mxu0 }
 0x3ea   : > { %v1002_v27 = vadd.f32 %v1001_v25, %v945_v22  ;;  %v1003_v28 = vpop.f32.mrb[6].mxu0 }
 0x3eb   : > { %v1049_v29 = vmax.f32 %v1000_v24, 0.0  ;;  %v1004_v30 = vadd.f32 %v1003_v28, %v950_v26  ;;  %v1005_v31 = vpop.f32.mrb[7].mxu0 }
 0x3ec   : > { %v1050_v32 = vmax.f32 %v1002_v27, 0.0  ;;  %v1006_v0 = vadd.f32 %v1005_v31, %v950_v26 }
 0x3ed   : > { %v1052_v33 = vmax.f32 %v1004_v30, 0.0  ;;  %v1055_v38 = vmul.f32 %v1049_v29, %v1808_v2 }
 0x3ee   : > { %v1042_v34 = vpop.f32.mrb[4].mxu1  ;;  %v1053_v35 = vmax.f32 %v1006_v0, 0.0  ;;  %v1056_v40 = vmul.f32 %v1050_v32, %v1810_v3 }
 0x3ef   : > { %v1043_v36 = vadd.f32 %v1042_v34, %v945_v22  ;;  %v1044_v37 = vpop.f32.mrb[5].mxu1  ;;  %v1058_v14 = vmul.f32 %v1052_v33, %v1808_v2 }
 0x3f0   : > { %v1045_v39 = vpop.f32.mrb[6].mxu1  ;;  %v1059_v41 = vmul.f32 %v1053_v35, %v1810_v3 }
 0x3f1   : > { %v1051_v42 = vmax.f32 %v1043_v36, 0.0  ;;  %v1046_v43 = vadd.f32 %v1045_v39, %v950_v26  ;;  %v1047_v44 = vpop.f32.mrb[7].mxu1  ;;  %v1061_v45 = vpack.c.bf16 %v1058_v14, %v1055_v38 }
 0x3f2   : > { %v1062_v46 = vpack.c.bf16 %v1059_v41, %v1056_v40 }
 0x3f3   : > { %v1054_v47 = vmax.f32 %v1046_v43, 0.0  ;;  %1067 = vrot.lane.b32.xlu0 %v1061_v45, %s1570_s11  ;;  %v1057_v48 = vmul.f32 %v1051_v42, %v1806_v54 }
 0x3f4   : > { %1069 = vrot.lane.b32.xlu1 %v1062_v46, %s1570_s11 }
 0x3f5   : > { %v1060_v49 = vmul.f32 %v1054_v47, %v1806_v54  ;;  %v1087_v54 = vld [vmem:[%s1939_s7 + $0x8] sm:$0xff] }
 0x3f7   : > { %v1063_v2 = vpack.c.bf16 %v1060_v49, %v1057_v48 }
 0x3f9   : > { %1071 = vrot.lane.b32.xlu0 %v1063_v2, %s1570_s11 }
 0x465   : > { %v1068_v50 = vpop.permute.xlu0 %1067 }
 0x466   : > { %1078 = vst.msk [vmem:[#allocation2] sm:$0xff] %vm739_vm15, %v1068_v50  ;;  %v1070_v3 = vpop.permute.xlu1 %1069 }
 0x467   : > { %v1073_v51 = vsel %vm733_vm0, %v1068_v50, %v1070_v3 }
 0x468   : > { %1079 = vst [vmem:[#allocation2 + $0x8] sm:$0xff] %v1073_v51  ;;  %1108 = vrot.lane.b32.xlu1 %v1073_v51, %s1561_s29 }
 0x46b   : > { %v1072_v52 = vpop.permute.xlu0 %1071 }
 0x46c   : > { %v1074_v53 = vsel %vm733_vm0, %v1070_v3, %v1072_v52 }
 0x46d   : > { %1080 = vst.msk [vmem:[#allocation2 + $0x10] sm:$0xff] %vm742_vm1, %v1074_v53  ;;  %v1081_v55 = vld [vmem:[#allocation2] sm:$0xff] }
 0x46e   : > { %1106 = vrot.lane.b32.xlu1 %v1081_v55, %s1561_s29 }
 0x472   : > { %1095 = vperm.xlu1 %1443, %v1087_v54  }
 0x474   : > { %v1083_v56 = vld [vmem:[#allocation2 + $0x10] sm:$0xff] }
 0x475   : > { %1110 = vrot.lane.b32.xlu0 %v1083_v56, %s1561_s29  ;;  %s1386_s29 = smul.u32 24, %s1952_s30 }
 0x477   : > { %s349_s25 = scalar_lea.vmem %s1940_s8, %s1386_s29 }
 0x479   : > { %1090 = vperm.xlu0 %1442, %v1086_v57  }
 0x4da   : > { %v1109_v58 = vpop.permute.xlu1 %1108 }
 0x4e0   : > { %v1107_v59 = vpop.permute.xlu1 %1106 }
 0x4e1   : > { %v1112_v63 = vsel %vm462_vm5, %v1107_v59, %v1109_v58 }
 0x4e7   : > { %v1111_v60 = vpop.permute.xlu0 %1110 }
 0x4e8   : > { %1380 = vmatpush3.bf16.msra.mxu1 %v1111_v60  ;;  %v1113_v62 = vsel %vm462_vm5, %v1109_v58, %v1111_v60 }
 0x4e9   : > { %1120 = vmatprep.subr.bf16.mxu0 %v1113_v62 }
 0x4ea   : > { %1121 = vmatpush1.bf16.msra.mxu0 %v1112_v63 }
 0x4eb   : > { %1382 = vmatmul.mubr.msk.bf16.vlgmr.msra.gmra.mrb[8].mxu1 %vm961_vm13, %v1451_v61 }
 0x4ed   : > { %1345 = vmatmul.mubr.msk.bf16.vlgmr.msra.gmra.mrb[8].mxu0 %vm961_vm13, %v1451_v61 }
 0x4f1   : > { %v1096_v5 = vpop.permute.xlu1 %1095 }
 0x4f8   : > { %v1091_v1 = vpop.permute.xlu0 %1090 }
 0x5be   : > { %v1197_v4 = vpop.f32.mrb[8].mxu1 }
 0x5bf   : > { %v1198_v6 = vadd.f32 %v1197_v4, %v1091_v1  ;;  %v1383_v7 = vpop.f32.mrb[9].mxu1 }
 0x5c0   : > { %v1154_v8 = vpop.f32.mrb[8].mxu0  ;;  %v1200_v9 = vpop.f32.mrb[10].mxu1 }
 0x5c1   : > { %v1206_v10 = vmax.f32 %v1198_v6, 0.0  ;;  %v1155_v11 = vadd.f32 %v1154_v8, %v1091_v1  ;;  %v1201_v12 = vadd.f32 %v1200_v9, %v1096_v5  ;;  %v1156_v13 = vpop.f32.mrb[9].mxu0  ;;  %v1384_v15 = vpop.f32.mrb[11].mxu1 }
 0x5c2   : > { %v1157_v16 = vadd.f32 %v1156_v13, %v1091_v1  ;;  %v1158_v17 = vpop.f32.mrb[10].mxu0 }
 0x5c3   : > { %v1354_v18 = vpack.c.bf16 %v1206_v10, %v1206_v10  ;;  %v1204_v19 = vmax.f32 %v1155_v11, 0.0  ;;  %v1209_v20 = vmax.f32 %v1201_v12, 0.0  ;;  %v1159_v21 = vadd.f32 %v1158_v17, %v1096_v5  ;;  %v1160_v22 = vpop.f32.mrb[11].mxu0 }
 0x5c4   : > { %v1205_v23 = vmax.f32 %v1157_v16, 0.0  ;;  %v1161_v24 = vadd.f32 %v1160_v22, %v1096_v5 }
 0x5c5   : > { %1231 = vst.msk [vmem:[%s349_s25 + $0x8] sm:$0xf] %vm378_vm2, %v1354_v18  ;;  %v1356_v25 = vpack.c.bf16 %v1209_v20, %v1209_v20  ;;  %v1207_v26 = vmax.f32 %v1159_v21, 0.0 }
 0x5c6   : > { %v1353_v27 = vpack.c.bf16 %v1205_v23, %v1204_v19  ;;  %v1208_v28 = vmax.f32 %v1161_v24, 0.0 }
 0x5c7   : > { %1233 = vst.msk [vmem:[%s349_s25 + $0x14] sm:$0xf] %vm378_vm2, %v1356_v25 }
 0x5c8   : > { %1230 = vst [vmem:[%s349_s25] sm:$0xff] %v1353_v27  ;;  %v1355_v29 = vpack.c.bf16 %v1208_v28, %v1207_v26 }
 0x5ca   : > { %1232 = vst [vmem:[%s349_s25 + $0xc] sm:$0xff] %v1355_v29 }
 0x5cb PF: > { %s20_s27 = sadd.s32 1, %s1550_s27  }
 0x5cc   : > { %p17_p5 = scmp.ge.s32.totalorder %s20_s27, 4  }
 0x5ce   :  { %19 = sbr.rel (!%p17_p5) target bundleno = 2 (0x2), region = 95 }
 0x5d5   :  { %1255 = vsyncpa [#allocation5], 1 }
 0x5d6   :  { %1257 = vsyncpa [#allocation5 + $0x1], 1 }
 0x5d7   :  { %1258 = vsyncpa [#allocation7], 1 }

</bundles_post_ra>
